<compile_context>
chip_gen: v7x
topology: tpu7x:2x2x1
jax: 0.10.0
libtpu: 0.0.40
codegen_flags: <defaults>
</compile_context>

<pallas_src>
import jax
import jax.numpy as jnp
from jax import lax
from jax.experimental import pallas as pl
from jax.experimental.pallas import tpu as pltpu


def _round_up(x, m):
    return ((x + m - 1) // m) * m


# ---------------------------------------------------------------------------
# Bilinear x2 upsample (align_corners=True) as separable interpolation matmuls
# ---------------------------------------------------------------------------
def _interp_matrix(s_in, s_out):
    if s_in == 1:
        return jnp.ones((s_out, 1), jnp.float32)
    src = jnp.arange(s_out, dtype=jnp.float32) * (s_in - 1) / (s_out - 1)
    lo = jnp.clip(jnp.floor(src).astype(jnp.int32), 0, s_in - 2)
    frac = src - lo.astype(jnp.float32)
    m = jnp.zeros((s_out, s_in), jnp.float32)
    m = m.at[jnp.arange(s_out), lo].add(1.0 - frac)
    m = m.at[jnp.arange(s_out), lo + 1].add(frac)
    return m


def _composed_x2_matrix(s_in, n_doublings):
    """Compose n successive x2 (align_corners=True) interp matrices into one."""
    m = jnp.eye(s_in, dtype=jnp.float32)
    s = s_in
    for _ in range(n_doublings):
        m = jnp.einsum('os,si->oi', _interp_matrix(s, 2 * s), m,
                       precision=lax.Precision.HIGHEST)
        s = 2 * s
    return m


def upsample_and_pad_nchw(x, n_doublings):
    """(N,C,h,w) -> (N,C, 2^k*h + 2, 2^k*w + 2) in one separable pass, with the
    conv zero-border folded into the interpolation matrices (zero edge rows)."""
    n, c, h, w = x.shape
    mh = jnp.pad(_composed_x2_matrix(h, n_doublings), ((1, 1), (0, 0)))
    mw = jnp.pad(_composed_x2_matrix(w, n_doublings), ((1, 1), (0, 0)))
    y = jnp.einsum('oh,nchw->ncow', mh, x, precision=lax.Precision.HIGHEST)
    y = jnp.einsum('pw,ncow->ncop', mw, y, precision=lax.Precision.HIGHEST)
    return y


def upsample2x_bilinear_nchw(x):
    """Plain x2 upsample (no padding) - used only by the pure-JAX reference."""
    n, c, h, w = x.shape
    mh = _interp_matrix(h, 2 * h)
    mw = _interp_matrix(w, 2 * w)
    y = jnp.einsum('oh,nchw->ncow', mh, x, precision=lax.Precision.HIGHEST)
    y = jnp.einsum('pw,ncow->ncop', mw, y, precision=lax.Precision.HIGHEST)
    return y


# ---------------------------------------------------------------------------
# Pallas kernel: fused (3x3 conv + BN + 1x1 conv), BN/conv5 folded into
# per-(channel, tap) scalars.  Grid = (image, channel-block); the channel axis
# is a reduction with the (1, H, W) output block resident / accumulating.
# ---------------------------------------------------------------------------
def agg_tail_kernel(w_ref, b_ref, x1_ref, x2_ref, x3_ref, o_ref):
    """
    w_ref  : SMEM (3*C*9,) folded weights, index = global_channel*9 + dy*3 + dx
             (global_channel runs over the concat order [x1, x2, x3])
    b_ref  : SMEM (1,)     folded bias
    x*_ref : VMEM (1, c_blk, H+2, W+2) zero-padded channel slab (full image)
    o_ref  : VMEM (1, H, W) float32 accumulator / output
    """
    cb = pl.program_id(1)
    ncb = pl.num_programs(1)
    c_blk = x1_ref.shape[1]
    c_per_input = c_blk * ncb
    h = o_ref.shape[1]
    w = o_ref.shape[2]

    @pl.when(cb == 0)
    def _():
        o_ref[...] = jnp.zeros_like(o_ref)

    def accumulate_input(ref, base, acc):
        # Channel-streaming: one channel plane live at a time (no vreg spill).
        def chan_body(ci, acc):
            woff = (base + cb * c_blk + ci) * 9
            ws = [w_ref[woff + t] for t in range(9)]      # hoisted scalar splats
            for dy in range(3):
                for dx in range(3):
                    # Shift-before-contract: small offset load from VMEM,
                    # scalar FMA straight into the single accumulator.
                    tap = ref[0, ci, dy:dy + h, dx:dx + w].astype(jnp.float32)
                    acc = acc + ws[dy * 3 + dx] * tap
            return acc
        return lax.fori_loop(0, c_blk, chan_body, acc)

    acc = jnp.zeros((h, w), jnp.float32)
    acc = accumulate_input(x1_ref, 0, acc)
    acc = accumulate_input(x2_ref, c_per_input, acc)
    acc = accumulate_input(x3_ref, 2 * c_per_input, acc)
    o_ref[0] += acc

    @pl.when(cb == ncb - 1)
    def _():
        o_ref[0] += b_ref[0]


# ---------------------------------------------------------------------------
# VMEM accounting (includes (8,128) layout padding of the last two dims)
# ---------------------------------------------------------------------------
def _padded_block_bytes(c_blk, h, w, itemsize):
    hp = _round_up(h + 2, 8)
    wp = _round_up(w + 2, 128)
    return c_blk * hp * wp * itemsize


def _out_block_bytes(h, w):
    return _round_up(h, 8) * _round_up(w, 128) * 4


def _choose_c_blk(c, h, w, itemsize, budget_bytes=20 * 1024 * 1024):
    """Largest divisor of C whose double-buffered, layout-padded blocks fit a
    conservative budget (safe on v7x's 64 MiB VMEM as well as v5e/v6e)."""
    out_bytes = 2 * _out_block_bytes(h, w)
    for cand in sorted((d for d in range(1, c + 1) if c % d == 0), reverse=True):
        need = 2 * 3 * _padded_block_bytes(cand, h, w, itemsize) + out_bytes
        if need <= budget_bytes:
            return cand
    return 1


def _vmem_limit_bytes(c_blk, h, w, itemsize):
    need = (2 * 3 * _padded_block_bytes(c_blk, h, w, itemsize)
            + 2 * _out_block_bytes(h, w) + (1 << 20))
    return int(min(max(2 * need, 32 * 1024 * 1024), 96 * 1024 * 1024))


def _run_agg_tail(w_flat, b_eff, x1p, x2p, x3p, h, w, c_blk, vmem_limit):
    n, c = x3p.shape[0], x3p.shape[1]
    ncb = c // c_blk

    def in_spec():
        return pl.BlockSpec((1, c_blk, h + 2, w + 2),
                            lambda ni, cbi: (ni, cbi, 0, 0))

    return pl.pallas_call(
        agg_tail_kernel,
        out_shape=jax.ShapeDtypeStruct((n, h, w), jnp.float32),
        grid=(n, ncb),
        in_specs=[
            pl.BlockSpec(memory_space=pltpu.MemorySpace.SMEM),   # folded weights
            pl.BlockSpec(memory_space=pltpu.MemorySpace.SMEM),   # folded bias
            in_spec(), in_spec(), in_spec(),
        ],
        out_specs=pl.BlockSpec((1, h, w), lambda ni, cbi: (ni, 0, 0)),
        compiler_params=pltpu.CompilerParams(
            dimension_semantics=("parallel", "arbitrary"),
            vmem_limit_bytes=vmem_limit),
    )(w_flat, b_eff, x1p, x2p, x3p)


# ---------------------------------------------------------------------------
# Wrapper-side parameter folding
# ---------------------------------------------------------------------------
def fold_params(params):
    """Fold conv4(+BN) -> conv5 into per-(channel, tap) scalars + bias."""
    w4 = params['w4'].astype(jnp.float32)                        # (3,3,C3,C3) HWIO
    scale = params['bn_scale'].reshape(-1).astype(jnp.float32)   # (C3,)
    shift = params['bn_shift'].reshape(-1).astype(jnp.float32)   # (C3,)
    w5 = params['w5'].reshape(-1).astype(jnp.float32)            # (C3,)
    b5 = params['b5'].reshape(()).astype(jnp.float32)
    v = scale * w5                                               # per-out-channel factor
    w_eff = jnp.einsum('yxio,o->iyx', w4, v,
                       precision=lax.Precision.HIGHEST)          # (C3, 3, 3)
    w_flat = w_eff.reshape(-1)                                   # idx = ci*9 + dy*3 + dx
    b_eff = jnp.dot(shift, w5, precision=lax.Precision.HIGHEST) + b5
    return w_flat, b_eff.reshape(1)


# ---------------------------------------------------------------------------
# Module forward (NCHW in / NCHW out, like the PyTorch module)
# ---------------------------------------------------------------------------
def replace_aggregation_init_forward(x1, x2, x3, params, c_blk=None,
                                     compute_dtype=jnp.float32):
    n, c, h, w = x3.shape

    # x1 at 1/4 res -> composed single-pass 4x upsample with fused zero border;
    # x2 at 1/2 res -> 2x upsample with fused zero border; x3 -> cheap pad.
    x1p = upsample_and_pad_nchw(x1, 2).astype(compute_dtype)
    x2p = upsample_and_pad_nchw(x2, 1).astype(compute_dtype)
    x3p = jnp.pad(x3, ((0, 0), (0, 0), (1, 1), (1, 1))).astype(compute_dtype)

    itemsize = jnp.dtype(compute_dtype).itemsize
    if c_blk is None or c_blk <= 0 or c % c_blk != 0:
        c_blk = _choose_c_blk(c, h, w, itemsize)
    vmem_limit = _vmem_limit_bytes(c_blk, h, w, itemsize)

    w_flat, b_eff = fold_params(params)
    out = _run_agg_tail(w_flat, b_eff, x1p, x2p, x3p, h, w, c_blk, vmem_limit)
    return out[:, None, :, :]                                    # (N, 1, H, W)


# ---------------------------------------------------------------------------
# Deterministic parameter init (shapes implied by __init__, channel -> 3C)
# ---------------------------------------------------------------------------
def init_params(key, channel):
    c3 = 3 * channel
    ks = jax.random.split(key, 6)
    w4 = 0.1 * jax.random.normal(ks[0], (3, 3, c3, c3), jnp.float32)  # HWIO
    gamma = 1.0 + 0.1 * jax.random.normal(ks[1], (c3,), jnp.float32)
    beta = 0.1 * jax.random.normal(ks[2], (c3,), jnp.float32)
    running_mean = 0.1 * jax.random.normal(ks[3], (c3,), jnp.float32)
    running_var = jnp.abs(1.0 + 0.1 * jax.random.normal(ks[4], (c3,), jnp.float32))
    eps = 1e-5
    scale = gamma / jnp.sqrt(running_var + eps)
    shift = beta - running_mean * scale
    w5 = 0.1 * jax.random.normal(ks[5], (c3, 1), jnp.float32)
    b5 = jnp.zeros((1, 1), jnp.float32)
    return dict(w4=w4,
                bn_scale=scale.reshape(1, c3),
                bn_shift=shift.reshape(1, c3),
                w5=w5, b5=b5)


# ---------------------------------------------------------------------------
# Pure-JAX reference (unfolded params -> also validates the BN/conv5 fold,
# the composed 4x upsample matrix and the fused zero border)
# ---------------------------------------------------------------------------
def reference_forward(x1, x2, x3, params):
    x1u = upsample2x_bilinear_nchw(upsample2x_bilinear_nchw(x1))
    x2u = upsample2x_bilinear_nchw(x2)
    x = jnp.concatenate([x1u, x2u, x3], axis=1)
    y = lax.conv_general_dilated(
        x, params['w4'], (1, 1), 'SAME',
        dimension_numbers=('NCHW', 'HWIO', 'NCHW'),
        precision=lax.Precision.HIGHEST)
    y = y * params['bn_scale'].reshape(1, -1, 1, 1) \
        + params['bn_shift'].reshape(1, -1, 1, 1)
    out = jnp.einsum('nchw,co->nohw', y, params['w5'],
                     precision=lax.Precision.HIGHEST) \
        + params['b5'].reshape(1, 1, 1, 1)
    return out


if __name__ == "__main__":
    key = jax.random.PRNGKey(0)
    channel = 4
    n, h, w = 2, 16, 16
    kx1, kx2, kx3, kp = jax.random.split(key, 4)

    # x1 at 1/4 resolution, x2 at 1/2 resolution, x3 at full resolution (NCHW).
    x1 = jax.random.normal(kx1, (n, channel, h // 4, w // 4), jnp.float32)
    x2 = jax.random.normal(kx2, (n, channel, h // 2, w // 2), jnp.float32)
    x3 = jax.random.normal(kx3, (n, channel, h, w), jnp.float32)
    params = init_params(kp, channel)

    # c_blk=2 forces two channel-reduction grid steps so the accumulator
    # init / accumulate / finalize path is exercised by the check below.
    out = replace_aggregation_init_forward(x1, x2, x3, params, c_blk=2)
    out = jax.block_until_ready(out)

    ref = reference_forward(x1, x2, x3, params)
    assert out.shape == (n, 1, h, w), out.shape
    max_err = float(jnp.max(jnp.abs(out - ref)))
    assert jnp.allclose(out, ref, atol=1e-3, rtol=1e-3), max_err

    print("KERNEL_OK")
</pallas_src>

<mosaic_0001>
module attributes {stable_mosaic.version = 11 : i64} {
  func.func @agg_tail_kernel(%arg0: i32, %arg1: i32, %arg2: memref<108xf32, #tpu.memory_space<smem>>, %arg3: memref<1xf32, #tpu.memory_space<smem>>, %arg4: memref<1x2x18x18xf32, #tpu.memory_space<vmem>>, %arg5: memref<1x2x18x18xf32, #tpu.memory_space<vmem>>, %arg6: memref<1x2x18x18xf32, #tpu.memory_space<vmem>>, %arg7: memref<1x16x16xf32, #tpu.memory_space<vmem>>) attributes {dimension_semantics = [#tpu.dimension_semantics<parallel>, #tpu.dimension_semantics<arbitrary>], iteration_bounds = array<i64: 2, 2>, scalar_prefetch = 0 : i64, scratch_operands = 0 : i64, tpu.core_type = #tpu.core_type<tc>, window_params = [{transform_indices = @transform_0, window_bounds = array<i64: 108>}, {transform_indices = @transform_1, window_bounds = array<i64: 1>}, {transform_indices = @transform_2, window_bounds = array<i64: 1, 2, 18, 18>}, {transform_indices = @transform_3, window_bounds = array<i64: 1, 2, 18, 18>}, {transform_indices = @transform_4, window_bounds = array<i64: 1, 2, 18, 18>}, {transform_indices = @transform_5, window_bounds = array<i64: 1, 16, 16>}]} {
    %c0_i32 = arith.constant 0 : i32
    %0 = arith.cmpi eq, %arg1, %c0_i32 : i32
    %1 = arith.extui %0 : i1 to i32
    %c0_i32_0 = arith.constant 0 : i32
    %2 = arith.cmpi ne, %1, %c0_i32_0 : i32
    scf.if %2 {
      %cst_18 = arith.constant 0.000000e+00 : f32
      %19 = vector.broadcast %cst_18 : f32 to vector<1x16x16xf32>
      %c0_19 = arith.constant 0 : index
      %c0_20 = arith.constant 0 : index
      %c0_21 = arith.constant 0 : index
      %20 = vector.load %arg7[%c0_19, %c0_20, %c0_21] : memref<1x16x16xf32, #tpu.memory_space<vmem>>, vector<1x16x16xf32>
      tpu.vector_store %arg7[%c0_19, %c0_20, %c0_21], %19 {strides = array<i32>} : memref<1x16x16xf32, #tpu.memory_space<vmem>>, vector<1x16x16xf32>,
    } else {
    }
    %cst = arith.constant 0.000000e+00 : f32
    %3 = vector.broadcast %cst : f32 to vector<16x16xf32>
    %c0_i32_1 = arith.constant 0 : i32
    %c2_i32 = arith.constant 2 : i32
    %4 = arith.addi %c0_i32_1, %c2_i32 : i32
    %c1_i32 = arith.constant 1 : i32
    %5 = scf.for %arg8 = %c0_i32_1 to %4 step %c1_i32 iter_args(%arg9 = %3) -> (vector<16x16xf32>)  : i32 {
      %c2_i32_18 = arith.constant 2 : i32
      %19 = arith.muli %arg1, %c2_i32_18 : i32
      %c0_i32_19 = arith.constant 0 : i32
      %20 = arith.addi %c0_i32_19, %19 : i32
      %21 = arith.addi %20, %arg8 : i32
      %c9_i32 = arith.constant 9 : i32
      %22 = arith.muli %21, %c9_i32 : i32
      %c0_i32_20 = arith.constant 0 : i32
      %23 = arith.addi %22, %c0_i32_20 : i32
      %24 = arith.index_cast %23 : i32 to index
      %25 = memref.load %arg2[%24] : memref<108xf32, #tpu.memory_space<smem>>
      %c1_i32_21 = arith.constant 1 : i32
      %26 = arith.addi %22, %c1_i32_21 : i32
      %27 = arith.index_cast %26 : i32 to index
      %28 = memref.load %arg2[%27] : memref<108xf32, #tpu.memory_space<smem>>
      %c2_i32_22 = arith.constant 2 : i32
      %29 = arith.addi %22, %c2_i32_22 : i32
      %30 = arith.index_cast %29 : i32 to index
      %31 = memref.load %arg2[%30] : memref<108xf32, #tpu.memory_space<smem>>
      %c3_i32 = arith.constant 3 : i32
      %32 = arith.addi %22, %c3_i32 : i32
      %33 = arith.index_cast %32 : i32 to index
      %34 = memref.load %arg2[%33] : memref<108xf32, #tpu.memory_space<smem>>
      %c4_i32 = arith.constant 4 : i32
      %35 = arith.addi %22, %c4_i32 : i32
      %36 = arith.index_cast %35 : i32 to index
      %37 = memref.load %arg2[%36] : memref<108xf32, #tpu.memory_space<smem>>
      %c5_i32 = arith.constant 5 : i32
      %38 = arith.addi %22, %c5_i32 : i32
      %39 = arith.index_cast %38 : i32 to index
      %40 = memref.load %arg2[%39] : memref<108xf32, #tpu.memory_space<smem>>
      %c6_i32 = arith.constant 6 : i32
      %41 = arith.addi %22, %c6_i32 : i32
      %42 = arith.index_cast %41 : i32 to index
      %43 = memref.load %arg2[%42] : memref<108xf32, #tpu.memory_space<smem>>
      %c7_i32 = arith.constant 7 : i32
      %44 = arith.addi %22, %c7_i32 : i32
      %45 = arith.index_cast %44 : i32 to index
      %46 = memref.load %arg2[%45] : memref<108xf32, #tpu.memory_space<smem>>
      %c8_i32 = arith.constant 8 : i32
      %47 = arith.addi %22, %c8_i32 : i32
      %48 = arith.index_cast %47 : i32 to index
      %49 = memref.load %arg2[%48] : memref<108xf32, #tpu.memory_space<smem>>
      %c0_23 = arith.constant 0 : index
      %50 = arith.index_cast %arg8 : i32 to index
      %c0_24 = arith.constant 0 : index
      %c0_25 = arith.constant 0 : index
      %51 = vector.load %arg4[%c0_23, %50, %c0_24, %c0_25] : memref<1x2x18x18xf32, #tpu.memory_space<vmem>>, vector<1x1x16x16xf32>
      %52 = vector.shape_cast %51 : vector<1x1x16x16xf32> to vector<16x16xf32>
      %53 = vector.broadcast %25 : f32 to vector<16x16xf32>
      %54 = arith.mulf %53, %52 : vector<16x16xf32>
      %55 = arith.addf %arg9, %54 : vector<16x16xf32>
      %c0_26 = arith.constant 0 : index
      %56 = arith.index_cast %arg8 : i32 to index
      %c0_27 = arith.constant 0 : index
      %c1 = arith.constant 1 : index
      %57 = vector.load %arg4[%c0_26, %56, %c0_27, %c1] : memref<1x2x18x18xf32, #tpu.memory_space<vmem>>, vector<1x1x16x16xf32>
      %58 = vector.shape_cast %57 : vector<1x1x16x16xf32> to vector<16x16xf32>
      %59 = vector.broadcast %28 : f32 to vector<16x16xf32>
      %60 = arith.mulf %59, %58 : vector<16x16xf32>
      %61 = arith.addf %55, %60 : vector<16x16xf32>
      %c0_28 = arith.constant 0 : index
      %62 = arith.index_cast %arg8 : i32 to index
      %c0_29 = arith.constant 0 : index
      %c2 = arith.constant 2 : index
      %63 = vector.load %arg4[%c0_28, %62, %c0_29, %c2] : memref<1x2x18x18xf32, #tpu.memory_space<vmem>>, vector<1x1x16x16xf32>
      %64 = vector.shape_cast %63 : vector<1x1x16x16xf32> to vector<16x16xf32>
      %65 = vector.broadcast %31 : f32 to vector<16x16xf32>
      %66 = arith.mulf %65, %64 : vector<16x16xf32>
      %67 = arith.addf %61, %66 : vector<16x16xf32>
      %c0_30 = arith.constant 0 : index
      %68 = arith.index_cast %arg8 : i32 to index
      %c1_31 = arith.constant 1 : index
      %c0_32 = arith.constant 0 : index
      %69 = vector.load %arg4[%c0_30, %68, %c1_31, %c0_32] : memref<1x2x18x18xf32, #tpu.memory_space<vmem>>, vector<1x1x16x16xf32>
      %70 = vector.shape_cast %69 : vector<1x1x16x16xf32> to vector<16x16xf32>
      %71 = vector.broadcast %34 : f32 to vector<16x16xf32>
      %72 = arith.mulf %71, %70 : vector<16x16xf32>
      %73 = arith.addf %67, %72 : vector<16x16xf32>
      %c0_33 = arith.constant 0 : index
      %74 = arith.index_cast %arg8 : i32 to index
      %c1_34 = arith.constant 1 : index
      %c1_35 = arith.constant 1 : index
      %75 = vector.load %arg4[%c0_33, %74, %c1_34, %c1_35] : memref<1x2x18x18xf32, #tpu.memory_space<vmem>>, vector<1x1x16x16xf32>
      %76 = vector.shape_cast %75 : vector<1x1x16x16xf32> to vector<16x16xf32>
      %77 = vector.broadcast %37 : f32 to vector<16x16xf32>
      %78 = arith.mulf %77, %76 : vector<16x16xf32>
      %79 = arith.addf %73, %78 : vector<16x16xf32>
      %c0_36 = arith.constant 0 : index
      %80 = arith.index_cast %arg8 : i32 to index
      %c1_37 = arith.constant 1 : index
      %c2_38 = arith.constant 2 : index
      %81 = vector.load %arg4[%c0_36, %80, %c1_37, %c2_38] : memref<1x2x18x18xf32, #tpu.memory_space<vmem>>, vector<1x1x16x16xf32>
      %82 = vector.shape_cast %81 : vector<1x1x16x16xf32> to vector<16x16xf32>
      %83 = vector.broadcast %40 : f32 to vector<16x16xf32>
      %84 = arith.mulf %83, %82 : vector<16x16xf32>
      %85 = arith.addf %79, %84 : vector<16x16xf32>
      %c0_39 = arith.constant 0 : index
      %86 = arith.index_cast %arg8 : i32 to index
      %c2_40 = arith.constant 2 : index
      %c0_41 = arith.constant 0 : index
      %87 = vector.load %arg4[%c0_39, %86, %c2_40, %c0_41] : memref<1x2x18x18xf32, #tpu.memory_space<vmem>>, vector<1x1x16x16xf32>
      %88 = vector.shape_cast %87 : vector<1x1x16x16xf32> to vector<16x16xf32>
      %89 = vector.broadcast %43 : f32 to vector<16x16xf32>
      %90 = arith.mulf %89, %88 : vector<16x16xf32>
      %91 = arith.addf %85, %90 : vector<16x16xf32>
      %c0_42 = arith.constant 0 : index
      %92 = arith.index_cast %arg8 : i32 to index
      %c2_43 = arith.constant 2 : index
      %c1_44 = arith.constant 1 : index
      %93 = vector.load %arg4[%c0_42, %92, %c2_43, %c1_44] : memref<1x2x18x18xf32, #tpu.memory_space<vmem>>, vector<1x1x16x16xf32>
      %94 = vector.shape_cast %93 : vector<1x1x16x16xf32> to vector<16x16xf32>
      %95 = vector.broadcast %46 : f32 to vector<16x16xf32>
      %96 = arith.mulf %95, %94 : vector<16x16xf32>
      %97 = arith.addf %91, %96 : vector<16x16xf32>
      %c0_45 = arith.constant 0 : index
      %98 = arith.index_cast %arg8 : i32 to index
      %c2_46 = arith.constant 2 : index
      %c2_47 = arith.constant 2 : index
      %99 = vector.load %arg4[%c0_45, %98, %c2_46, %c2_47] : memref<1x2x18x18xf32, #tpu.memory_space<vmem>>, vector<1x1x16x16xf32>
      %100 = vector.shape_cast %99 : vector<1x1x16x16xf32> to vector<16x16xf32>
      %101 = vector.broadcast %49 : f32 to vector<16x16xf32>
      %102 = arith.mulf %101, %100 : vector<16x16xf32>
      %103 = arith.addf %97, %102 : vector<16x16xf32>
      scf.yield %103 : vector<16x16xf32>
    }
    %c2_i32_2 = arith.constant 2 : i32
    %c0_i32_3 = arith.constant 0 : i32
    %c2_i32_4 = arith.constant 2 : i32
    %6 = arith.addi %c0_i32_3, %c2_i32_4 : i32
    %c1_i32_5 = arith.constant 1 : i32
    %7 = scf.for %arg8 = %c0_i32_3 to %6 step %c1_i32_5 iter_args(%arg9 = %5) -> (vector<16x16xf32>)  : i32 {
      %c2_i32_18 = arith.constant 2 : i32
      %19 = arith.muli %arg1, %c2_i32_18 : i32
      %c4_i32 = arith.constant 4 : i32
      %20 = arith.addi %c4_i32, %19 : i32
      %21 = arith.addi %20, %arg8 : i32
      %c9_i32 = arith.constant 9 : i32
      %22 = arith.muli %21, %c9_i32 : i32
      %c0_i32_19 = arith.constant 0 : i32
      %23 = arith.addi %22, %c0_i32_19 : i32
      %24 = arith.index_cast %23 : i32 to index
      %25 = memref.load %arg2[%24] : memref<108xf32, #tpu.memory_space<smem>>
      %c1_i32_20 = arith.constant 1 : i32
      %26 = arith.addi %22, %c1_i32_20 : i32
      %27 = arith.index_cast %26 : i32 to index
      %28 = memref.load %arg2[%27] : memref<108xf32, #tpu.memory_space<smem>>
      %c2_i32_21 = arith.constant 2 : i32
      %29 = arith.addi %22, %c2_i32_21 : i32
      %30 = arith.index_cast %29 : i32 to index
      %31 = memref.load %arg2[%30] : memref<108xf32, #tpu.memory_space<smem>>
      %c3_i32 = arith.constant 3 : i32
      %32 = arith.addi %22, %c3_i32 : i32
      %33 = arith.index_cast %32 : i32 to index
      %34 = memref.load %arg2[%33] : memref<108xf32, #tpu.memory_space<smem>>
      %c4_i32_22 = arith.constant 4 : i32
      %35 = arith.addi %22, %c4_i32_22 : i32
      %36 = arith.index_cast %35 : i32 to index
      %37 = memref.load %arg2[%36] : memref<108xf32, #tpu.memory_space<smem>>
      %c5_i32 = arith.constant 5 : i32
      %38 = arith.addi %22, %c5_i32 : i32
      %39 = arith.index_cast %38 : i32 to index
      %40 = memref.load %arg2[%39] : memref<108xf32, #tpu.memory_space<smem>>
      %c6_i32 = arith.constant 6 : i32
      %41 = arith.addi %22, %c6_i32 : i32
      %42 = arith.index_cast %41 : i32 to index
      %43 = memref.load %arg2[%42] : memref<108xf32, #tpu.memory_space<smem>>
      %c7_i32 = arith.constant 7 : i32
      %44 = arith.addi %22, %c7_i32 : i32
      %45 = arith.index_cast %44 : i32 to index
      %46 = memref.load %arg2[%45] : memref<108xf32, #tpu.memory_space<smem>>
      %c8_i32 = arith.constant 8 : i32
      %47 = arith.addi %22, %c8_i32 : i32
      %48 = arith.index_cast %47 : i32 to index
      %49 = memref.load %arg2[%48] : memref<108xf32, #tpu.memory_space<smem>>
      %c0_23 = arith.constant 0 : index
      %50 = arith.index_cast %arg8 : i32 to index
      %c0_24 = arith.constant 0 : index
      %c0_25 = arith.constant 0 : index
      %51 = vector.load %arg5[%c0_23, %50, %c0_24, %c0_25] : memref<1x2x18x18xf32, #tpu.memory_space<vmem>>, vector<1x1x16x16xf32>
      %52 = vector.shape_cast %51 : vector<1x1x16x16xf32> to vector<16x16xf32>
      %53 = vector.broadcast %25 : f32 to vector<16x16xf32>
      %54 = arith.mulf %53, %52 : vector<16x16xf32>
      %55 = arith.addf %arg9, %54 : vector<16x16xf32>
      %c0_26 = arith.constant 0 : index
      %56 = arith.index_cast %arg8 : i32 to index
      %c0_27 = arith.constant 0 : index
      %c1 = arith.constant 1 : index
      %57 = vector.load %arg5[%c0_26, %56, %c0_27, %c1] : memref<1x2x18x18xf32, #tpu.memory_space<vmem>>, vector<1x1x16x16xf32>
      %58 = vector.shape_cast %57 : vector<1x1x16x16xf32> to vector<16x16xf32>
      %59 = vector.broadcast %28 : f32 to vector<16x16xf32>
      %60 = arith.mulf %59, %58 : vector<16x16xf32>
      %61 = arith.addf %55, %60 : vector<16x16xf32>
      %c0_28 = arith.constant 0 : index
      %62 = arith.index_cast %arg8 : i32 to index
      %c0_29 = arith.constant 0 : index
      %c2 = arith.constant 2 : index
      %63 = vector.load %arg5[%c0_28, %62, %c0_29, %c2] : memref<1x2x18x18xf32, #tpu.memory_space<vmem>>, vector<1x1x16x16xf32>
      %64 = vector.shape_cast %63 : vector<1x1x16x16xf32> to vector<16x16xf32>
      %65 = vector.broadcast %31 : f32 to vector<16x16xf32>
      %66 = arith.mulf %65, %64 : vector<16x16xf32>
      %67 = arith.addf %61, %66 : vector<16x16xf32>
      %c0_30 = arith.constant 0 : index
      %68 = arith.index_cast %arg8 : i32 to index
      %c1_31 = arith.constant 1 : index
      %c0_32 = arith.constant 0 : index
      %69 = vector.load %arg5[%c0_30, %68, %c1_31, %c0_32] : memref<1x2x18x18xf32, #tpu.memory_space<vmem>>, vector<1x1x16x16xf32>
      %70 = vector.shape_cast %69 : vector<1x1x16x16xf32> to vector<16x16xf32>
      %71 = vector.broadcast %34 : f32 to vector<16x16xf32>
      %72 = arith.mulf %71, %70 : vector<16x16xf32>
      %73 = arith.addf %67, %72 : vector<16x16xf32>
      %c0_33 = arith.constant 0 : index
      %74 = arith.index_cast %arg8 : i32 to index
      %c1_34 = arith.constant 1 : index
      %c1_35 = arith.constant 1 : index
      %75 = vector.load %arg5[%c0_33, %74, %c1_34, %c1_35] : memref<1x2x18x18xf32, #tpu.memory_space<vmem>>, vector<1x1x16x16xf32>
      %76 = vector.shape_cast %75 : vector<1x1x16x16xf32> to vector<16x16xf32>
      %77 = vector.broadcast %37 : f32 to vector<16x16xf32>
      %78 = arith.mulf %77, %76 : vector<16x16xf32>
      %79 = arith.addf %73, %78 : vector<16x16xf32>
      %c0_36 = arith.constant 0 : index
      %80 = arith.index_cast %arg8 : i32 to index
      %c1_37 = arith.constant 1 : index
      %c2_38 = arith.constant 2 : index
      %81 = vector.load %arg5[%c0_36, %80, %c1_37, %c2_38] : memref<1x2x18x18xf32, #tpu.memory_space<vmem>>, vector<1x1x16x16xf32>
      %82 = vector.shape_cast %81 : vector<1x1x16x16xf32> to vector<16x16xf32>
      %83 = vector.broadcast %40 : f32 to vector<16x16xf32>
      %84 = arith.mulf %83, %82 : vector<16x16xf32>
      %85 = arith.addf %79, %84 : vector<16x16xf32>
      %c0_39 = arith.constant 0 : index
      %86 = arith.index_cast %arg8 : i32 to index
      %c2_40 = arith.constant 2 : index
      %c0_41 = arith.constant 0 : index
      %87 = vector.load %arg5[%c0_39, %86, %c2_40, %c0_41] : memref<1x2x18x18xf32, #tpu.memory_space<vmem>>, vector<1x1x16x16xf32>
      %88 = vector.shape_cast %87 : vector<1x1x16x16xf32> to vector<16x16xf32>
      %89 = vector.broadcast %43 : f32 to vector<16x16xf32>
      %90 = arith.mulf %89, %88 : vector<16x16xf32>
      %91 = arith.addf %85, %90 : vector<16x16xf32>
      %c0_42 = arith.constant 0 : index
      %92 = arith.index_cast %arg8 : i32 to index
      %c2_43 = arith.constant 2 : index
      %c1_44 = arith.constant 1 : index
      %93 = vector.load %arg5[%c0_42, %92, %c2_43, %c1_44] : memref<1x2x18x18xf32, #tpu.memory_space<vmem>>, vector<1x1x16x16xf32>
      %94 = vector.shape_cast %93 : vector<1x1x16x16xf32> to vector<16x16xf32>
      %95 = vector.broadcast %46 : f32 to vector<16x16xf32>
      %96 = arith.mulf %95, %94 : vector<16x16xf32>
      %97 = arith.addf %91, %96 : vector<16x16xf32>
      %c0_45 = arith.constant 0 : index
      %98 = arith.index_cast %arg8 : i32 to index
      %c2_46 = arith.constant 2 : index
      %c2_47 = arith.constant 2 : index
      %99 = vector.load %arg5[%c0_45, %98, %c2_46, %c2_47] : memref<1x2x18x18xf32, #tpu.memory_space<vmem>>, vector<1x1x16x16xf32>
      %100 = vector.shape_cast %99 : vector<1x1x16x16xf32> to vector<16x16xf32>
      %101 = vector.broadcast %49 : f32 to vector<16x16xf32>
      %102 = arith.mulf %101, %100 : vector<16x16xf32>
      %103 = arith.addf %97, %102 : vector<16x16xf32>
      scf.yield %103 : vector<16x16xf32>
    }
    %c2_i32_6 = arith.constant 2 : i32
    %c0_i32_7 = arith.constant 0 : i32
    %c2_i32_8 = arith.constant 2 : i32
    %8 = arith.addi %c0_i32_7, %c2_i32_8 : i32
    %c1_i32_9 = arith.constant 1 : i32
    %9 = scf.for %arg8 = %c0_i32_7 to %8 step %c1_i32_9 iter_args(%arg9 = %7) -> (vector<16x16xf32>)  : i32 {
      %c2_i32_18 = arith.constant 2 : i32
      %19 = arith.muli %arg1, %c2_i32_18 : i32
      %c8_i32 = arith.constant 8 : i32
      %20 = arith.addi %c8_i32, %19 : i32
      %21 = arith.addi %20, %arg8 : i32
      %c9_i32 = arith.constant 9 : i32
      %22 = arith.muli %21, %c9_i32 : i32
      %c0_i32_19 = arith.constant 0 : i32
      %23 = arith.addi %22, %c0_i32_19 : i32
      %24 = arith.index_cast %23 : i32 to index
      %25 = memref.load %arg2[%24] : memref<108xf32, #tpu.memory_space<smem>>
      %c1_i32_20 = arith.constant 1 : i32
      %26 = arith.addi %22, %c1_i32_20 : i32
      %27 = arith.index_cast %26 : i32 to index
      %28 = memref.load %arg2[%27] : memref<108xf32, #tpu.memory_space<smem>>
      %c2_i32_21 = arith.constant 2 : i32
      %29 = arith.addi %22, %c2_i32_21 : i32
      %30 = arith.index_cast %29 : i32 to index
      %31 = memref.load %arg2[%30] : memref<108xf32, #tpu.memory_space<smem>>
      %c3_i32 = arith.constant 3 : i32
      %32 = arith.addi %22, %c3_i32 : i32
      %33 = arith.index_cast %32 : i32 to index
      %34 = memref.load %arg2[%33] : memref<108xf32, #tpu.memory_space<smem>>
      %c4_i32 = arith.constant 4 : i32
      %35 = arith.addi %22, %c4_i32 : i32
      %36 = arith.index_cast %35 : i32 to index
      %37 = memref.load %arg2[%36] : memref<108xf32, #tpu.memory_space<smem>>
      %c5_i32 = arith.constant 5 : i32
      %38 = arith.addi %22, %c5_i32 : i32
      %39 = arith.index_cast %38 : i32 to index
      %40 = memref.load %arg2[%39] : memref<108xf32, #tpu.memory_space<smem>>
      %c6_i32 = arith.constant 6 : i32
      %41 = arith.addi %22, %c6_i32 : i32
      %42 = arith.index_cast %41 : i32 to index
      %43 = memref.load %arg2[%42] : memref<108xf32, #tpu.memory_space<smem>>
      %c7_i32 = arith.constant 7 : i32
      %44 = arith.addi %22, %c7_i32 : i32
      %45 = arith.index_cast %44 : i32 to index
      %46 = memref.load %arg2[%45] : memref<108xf32, #tpu.memory_space<smem>>
      %c8_i32_22 = arith.constant 8 : i32
      %47 = arith.addi %22, %c8_i32_22 : i32
      %48 = arith.index_cast %47 : i32 to index
      %49 = memref.load %arg2[%48] : memref<108xf32, #tpu.memory_space<smem>>
      %c0_23 = arith.constant 0 : index
      %50 = arith.index_cast %arg8 : i32 to index
      %c0_24 = arith.constant 0 : index
      %c0_25 = arith.constant 0 : index
      %51 = vector.load %arg6[%c0_23, %50, %c0_24, %c0_25] : memref<1x2x18x18xf32, #tpu.memory_space<vmem>>, vector<1x1x16x16xf32>
      %52 = vector.shape_cast %51 : vector<1x1x16x16xf32> to vector<16x16xf32>
      %53 = vector.broadcast %25 : f32 to vector<16x16xf32>
      %54 = arith.mulf %53, %52 : vector<16x16xf32>
      %55 = arith.addf %arg9, %54 : vector<16x16xf32>
      %c0_26 = arith.constant 0 : index
      %56 = arith.index_cast %arg8 : i32 to index
      %c0_27 = arith.constant 0 : index
      %c1 = arith.constant 1 : index
      %57 = vector.load %arg6[%c0_26, %56, %c0_27, %c1] : memref<1x2x18x18xf32, #tpu.memory_space<vmem>>, vector<1x1x16x16xf32>
      %58 = vector.shape_cast %57 : vector<1x1x16x16xf32> to vector<16x16xf32>
      %59 = vector.broadcast %28 : f32 to vector<16x16xf32>
      %60 = arith.mulf %59, %58 : vector<16x16xf32>
      %61 = arith.addf %55, %60 : vector<16x16xf32>
      %c0_28 = arith.constant 0 : index
      %62 = arith.index_cast %arg8 : i32 to index
      %c0_29 = arith.constant 0 : index
      %c2 = arith.constant 2 : index
      %63 = vector.load %arg6[%c0_28, %62, %c0_29, %c2] : memref<1x2x18x18xf32, #tpu.memory_space<vmem>>, vector<1x1x16x16xf32>
      %64 = vector.shape_cast %63 : vector<1x1x16x16xf32> to vector<16x16xf32>
      %65 = vector.broadcast %31 : f32 to vector<16x16xf32>
      %66 = arith.mulf %65, %64 : vector<16x16xf32>
      %67 = arith.addf %61, %66 : vector<16x16xf32>
      %c0_30 = arith.constant 0 : index
      %68 = arith.index_cast %arg8 : i32 to index
      %c1_31 = arith.constant 1 : index
      %c0_32 = arith.constant 0 : index
      %69 = vector.load %arg6[%c0_30, %68, %c1_31, %c0_32] : memref<1x2x18x18xf32, #tpu.memory_space<vmem>>, vector<1x1x16x16xf32>
      %70 = vector.shape_cast %69 : vector<1x1x16x16xf32> to vector<16x16xf32>
      %71 = vector.broadcast %34 : f32 to vector<16x16xf32>
      %72 = arith.mulf %71, %70 : vector<16x16xf32>
      %73 = arith.addf %67, %72 : vector<16x16xf32>
      %c0_33 = arith.constant 0 : index
      %74 = arith.index_cast %arg8 : i32 to index
      %c1_34 = arith.constant 1 : index
      %c1_35 = arith.constant 1 : index
      %75 = vector.load %arg6[%c0_33, %74, %c1_34, %c1_35] : memref<1x2x18x18xf32, #tpu.memory_space<vmem>>, vector<1x1x16x16xf32>
      %76 = vector.shape_cast %75 : vector<1x1x16x16xf32> to vector<16x16xf32>
      %77 = vector.broadcast %37 : f32 to vector<16x16xf32>
      %78 = arith.mulf %77, %76 : vector<16x16xf32>
      %79 = arith.addf %73, %78 : vector<16x16xf32>
      %c0_36 = arith.constant 0 : index
      %80 = arith.index_cast %arg8 : i32 to index
      %c1_37 = arith.constant 1 : index
      %c2_38 = arith.constant 2 : index
      %81 = vector.load %arg6[%c0_36, %80, %c1_37, %c2_38] : memref<1x2x18x18xf32, #tpu.memory_space<vmem>>, vector<1x1x16x16xf32>
      %82 = vector.shape_cast %81 : vector<1x1x16x16xf32> to vector<16x16xf32>
      %83 = vector.broadcast %40 : f32 to vector<16x16xf32>
      %84 = arith.mulf %83, %82 : vector<16x16xf32>
      %85 = arith.addf %79, %84 : vector<16x16xf32>
      %c0_39 = arith.constant 0 : index
      %86 = arith.index_cast %arg8 : i32 to index
      %c2_40 = arith.constant 2 : index
      %c0_41 = arith.constant 0 : index
      %87 = vector.load %arg6[%c0_39, %86, %c2_40, %c0_41] : memref<1x2x18x18xf32, #tpu.memory_space<vmem>>, vector<1x1x16x16xf32>
      %88 = vector.shape_cast %87 : vector<1x1x16x16xf32> to vector<16x16xf32>
      %89 = vector.broadcast %43 : f32 to vector<16x16xf32>
      %90 = arith.mulf %89, %88 : vector<16x16xf32>
      %91 = arith.addf %85, %90 : vector<16x16xf32>
      %c0_42 = arith.constant 0 : index
      %92 = arith.index_cast %arg8 : i32 to index
      %c2_43 = arith.constant 2 : index
      %c1_44 = arith.constant 1 : index
      %93 = vector.load %arg6[%c0_42, %92, %c2_43, %c1_44] : memref<1x2x18x18xf32, #tpu.memory_space<vmem>>, vector<1x1x16x16xf32>
      %94 = vector.shape_cast %93 : vector<1x1x16x16xf32> to vector<16x16xf32>
      %95 = vector.broadcast %46 : f32 to vector<16x16xf32>
      %96 = arith.mulf %95, %94 : vector<16x16xf32>
      %97 = arith.addf %91, %96 : vector<16x16xf32>
      %c0_45 = arith.constant 0 : index
      %98 = arith.index_cast %arg8 : i32 to index
      %c2_46 = arith.constant 2 : index
      %c2_47 = arith.constant 2 : index
      %99 = vector.load %arg6[%c0_45, %98, %c2_46, %c2_47] : memref<1x2x18x18xf32, #tpu.memory_space<vmem>>, vector<1x1x16x16xf32>
      %100 = vector.shape_cast %99 : vector<1x1x16x16xf32> to vector<16x16xf32>
      %101 = vector.broadcast %49 : f32 to vector<16x16xf32>
      %102 = arith.mulf %101, %100 : vector<16x16xf32>
      %103 = arith.addf %97, %102 : vector<16x16xf32>
      scf.yield %103 : vector<16x16xf32>
    }
    %c2_i32_10 = arith.constant 2 : i32
    %c0 = arith.constant 0 : index
    %c0_11 = arith.constant 0 : index
    %c0_12 = arith.constant 0 : index
    %10 = vector.load %arg7[%c0, %c0_11, %c0_12] : memref<1x16x16xf32, #tpu.memory_space<vmem>>, vector<1x16x16xf32>
    %11 = vector.shape_cast %10 : vector<1x16x16xf32> to vector<16x16xf32>
    %12 = arith.addf %11, %9 : vector<16x16xf32>
    %c0_13 = arith.constant 0 : index
    %c0_14 = arith.constant 0 : index
    %c0_15 = arith.constant 0 : index
    %13 = vector.load %arg7[%c0_13, %c0_14, %c0_15] : memref<1x16x16xf32, #tpu.memory_space<vmem>>, vector<1x16x16xf32>
    %14 = vector.shape_cast %13 : vector<1x16x16xf32> to vector<16x16xf32>
    %15 = vector.shape_cast %12 : vector<16x16xf32> to vector<1x16x16xf32>
    tpu.vector_store %arg7[%c0_13, %c0_14, %c0_15], %15 {strides = array<i32>} : memref<1x16x16xf32, #tpu.memory_space<vmem>>, vector<1x16x16xf32>,
    %c1_i32_16 = arith.constant 1 : i32
    %16 = arith.cmpi eq, %arg1, %c1_i32_16 : i32
    %17 = arith.extui %16 : i1 to i32
    %c0_i32_17 = arith.constant 0 : i32
    %18 = arith.cmpi ne, %17, %c0_i32_17 : i32
    scf.if %18 {
      %c0_18 = arith.constant 0 : index
      %c0_19 = arith.constant 0 : index
      %c0_20 = arith.constant 0 : index
      %19 = vector.load %arg7[%c0_18, %c0_19, %c0_20] : memref<1x16x16xf32, #tpu.memory_space<vmem>>, vector<1x16x16xf32>
      %20 = vector.shape_cast %19 : vector<1x16x16xf32> to vector<16x16xf32>
      %c0_21 = arith.constant 0 : index
      %21 = memref.load %arg3[%c0_21] : memref<1xf32, #tpu.memory_space<smem>>
      %22 = vector.broadcast %21 : f32 to vector<16x16xf32>
      %23 = arith.addf %20, %22 : vector<16x16xf32>
      %c0_22 = arith.constant 0 : index
      %c0_23 = arith.constant 0 : index
      %c0_24 = arith.constant 0 : index
      %24 = vector.load %arg7[%c0_22, %c0_23, %c0_24] : memref<1x16x16xf32, #tpu.memory_space<vmem>>, vector<1x16x16xf32>
      %25 = vector.shape_cast %24 : vector<1x16x16xf32> to vector<16x16xf32>
      %26 = vector.shape_cast %23 : vector<16x16xf32> to vector<1x16x16xf32>
      tpu.vector_store %arg7[%c0_22, %c0_23, %c0_24], %26 {strides = array<i32>} : memref<1x16x16xf32, #tpu.memory_space<vmem>>, vector<1x16x16xf32>,
    } else {
    }
    return
  }
  func.func @transform_0(%arg0: i32, %arg1: i32) -> i32 {
    %c0_i32 = arith.constant 0 : i32
    %c0_i32_0 = arith.constant 0 : i32
    return %c0_i32 : i32
  }
  func.func @transform_1(%arg0: i32, %arg1: i32) -> i32 {
    %c0_i32 = arith.constant 0 : i32
    %c0_i32_0 = arith.constant 0 : i32
    return %c0_i32 : i32
  }
  func.func @transform_2(%arg0: i32, %arg1: i32) -> (i32, i32, i32, i32) {
    %c0_i32 = arith.constant 0 : i32
    %c0_i32_0 = arith.constant 0 : i32
    %c0_i32_1 = arith.constant 0 : i32
    return %arg0, %arg1, %c0_i32, %c0_i32_0 : i32, i32, i32, i32
  }
  func.func @transform_3(%arg0: i32, %arg1: i32) -> (i32, i32, i32, i32) {
    %c0_i32 = arith.constant 0 : i32
    %c0_i32_0 = arith.constant 0 : i32
    %c0_i32_1 = arith.constant 0 : i32
    return %arg0, %arg1, %c0_i32, %c0_i32_0 : i32, i32, i32, i32
  }
  func.func @transform_4(%arg0: i32, %arg1: i32) -> (i32, i32, i32, i32) {
    %c0_i32 = arith.constant 0 : i32
    %c0_i32_0 = arith.constant 0 : i32
    %c0_i32_1 = arith.constant 0 : i32
    return %arg0, %arg1, %c0_i32, %c0_i32_0 : i32, i32, i32, i32
  }
  func.func @transform_5(%arg0: i32, %arg1: i32) -> (i32, i32, i32) {
    %c0_i32 = arith.constant 0 : i32
    %c0_i32_0 = arith.constant 0 : i32
    %c0_i32_1 = arith.constant 0 : i32
    return %arg0, %c0_i32, %c0_i32_0 : i32, i32, i32
  }
}

</mosaic_0001>

<bundles_post_ra>
// kernel: tpu_custom_call.1
= control target key start
LH: loop header
LB: loop body
LE: loop exit
PB: predicated region body
PF: predicated region fallthrough
CT: control target
= control target key end

     0   :  { %s1779_s0 = inlined_call_operand.vmem [shape: f32[108], index: 0, kind: input, shape index: {}]   ;;  %s1780_s1 = inlined_call_operand.<no memory space> [shape: f32[1], index: 1, kind: input, shape index: {}]   ;;  %s1781_s2 = inlined_call_operand.vmem [shape: f32[2,4,18,18], index: 2, kind: input, shape index: {}]   ;;  %s1782_s3 = inlined_call_operand.vmem [shape: f32[2,4,18,18], index: 3, kind: input, shape index: {}]   ;;  %s1783_s4 = inlined_call_operand.vmem [shape: f32[2,4,18,18], index: 4, kind: input, shape index: {}]   ;;  %s1784_s5 = inlined_call_operand.hbm [shape: f32[2,16,16], index: 5, kind: output, shape index: {}]  }
   0x1   :  { %1788 = sst [smem:[#allocation12_spill]] %s1779_s0 }
   0x2   :  { %1789 = sst [smem:[#allocation13_spill]] %s1781_s2 }
   0x3   :  { %10 = sst [smem:[#allocation2]] %s1780_s1 }
   0x4   :  { %11 = vsyncpa [#allocation5], 0 }
   0x5   :  { %12 = vsyncpa [#allocation4], 0 }
   0x6   :  { %14 = vsyncpa [#allocation4 + $0x1], 0  ;;  %s1372_s20 = smov 0   ;;  %s1374_s21 = smov 0  }
   0x7   :  { %s1376_s22 = smov 0   ;;  %s1378_s23 = smov 0  }
   0x8   :  { %s1380_s24 = smov 0   ;;  %s1382_s25 = smov 0  }
   0x9   :  { %s1384_s26 = smov 0   ;;  %s1386_s27 = smov 0  }
   0xa LB: > { %1790 = sst [smem:[#allocation9_spill]] %s1286_s26  ;;  %s951_s1 = sadd.s32 4294967295, %s1290_s27   ;;  %s1290_s27 = sphi %s1386_s27, %s20_s27   ;;  %s1286_s26 = sphi %s1384_s26, %s1812_s26   ;;  %s1282_s25 = sphi %s1382_s25, %s1817_s25   ;;  %s1278_s24 = sphi %s1380_s24, %s1810_s24   ;;  %s1274_s23 = sphi %s1378_s23, %s1816_s23   ;;  %s1270_s22 = sphi %s1376_s22, %s1815_s22   ;;  %s1266_s21 = sphi %s1374_s21, %s1814_s21   ;;  %s1262_s20 = sphi %s1372_s20, %s1813_s20  }
   0xb   : > { %s952_s28 = sadd.s32 4294967294, %s1290_s27   ;;  %s29_s29 = sadd.s32 1, %s1282_s25 }
   0xc   : > { %s32_s30 = sadd.s32 1, %s1286_s26  ;;  %p30_p0 = scmp.ge.s32.totalorder %s29_s29, 2 }
   0xd   : > { %s165_s6 = sadd.s32 1, %s1270_s22  ;;  %p175_p1 = scmp.ne.s32.totalorder %s1270_s22, %s1266_s21 }
   0xe   : > { %p176_p2 = scmp.eq.s32.totalorder %s951_s1, 3  ;;  %s1819_s29 = smov (%p30_p0, %s29_s29), 0 }
   0xf   : > { %1791 = sst [smem:[#allocation10_spill]] %s1819_s29  ;;  %s1821_s30 = smov (!%p30_p0, %s32_s30), %s1286_s26 }
  0x10   : > { %p1422_p3 = por %p176_p2, %p175_p1  ;;  %p181_p4 = scmp.ne.s32.totalorder %s1266_s21, %s1262_s20 }
  0x11   : > { %p34_p5 = scmp.ge.s32.totalorder %s1821_s30, 2  ;;  %p182_p6 = scmp.eq.s32.totalorder %s952_s28, 3 }
  0x12   : > { %p953_p7 = scmp.ge.s32.totalorder %s1290_s27, 1  ;;  %p189_p8 = scmp.lt.s32.totalorder %s1290_s27, 5 }
  0x13   : > { %s1823_s30 = smov (%p34_p5, %s1821_s30), 0  ;;  %p1432_p9 = por %p182_p6, %p181_p4 }
  0x14   : > { %1793 = sst [smem:[#allocation11_spill]] %s1823_s30  ;;  %p1436_p10 = pnand %p953_p7, %p189_p8 }
  0x15   : > { %s1794_s8 = scalar_select %p1432_p9, 1, 0 }
  0x16   : > { %s162_s10 = ssub.s32 %s1286_s26, %s1823_s30  ;;  %p984_p12 = pneg %p1436_p10 }
  0x17   : > { %p163_p11 = scmp.eq.s32.totalorder %s162_s10, 0  ;;  %p1444_p13 = scmp.eq.s32.totalorder %s951_s1, 0 }
  0x18   : > { %s1797_s0 = sld [smem:[#allocation12_spill]] }
  0x19   : > { %s1452_s15 = scalar_select %p163_p11, %s1270_s22, %s165_s6  }
  0x1a   : > { %p985_p0 = pnand %p1444_p13, %p984_p12 }
  0x1c   : > { %p1143_p2 = pneg %p985_p0 }
  0x1e   : > { %s202_s14 = sshll.u32 %s1797_s0, 4  ;;  %s203_s14 = int_to_ptr.vmem [resolvable:$true] %s202_s14 }
  0x1f   : > { %s1141_s16 = scalar_lea.vmem %s203_s14, 16  ;;  %p1149_p6 = scmp.lt.s32.totalorder %s203_s14, %s203_s14 }
  0x20   : > { %p1142_p1 = scmp.ne.s32.totalorder %s203_s14, %s1141_s16  ;;  %p1150_p7 = scmp.lt.s32.totalorder %s1141_s16, %s1141_s16 }
  0x22   : > { %p1144_p4 = pnand %p1143_p2, %p1142_p1  ;;  %p1151_p8 = por %p1150_p7, %p1149_p6 }
  0x24   : > { %p1145_p5 = pneg %p1144_p4 }
  0x26   : > { %p1152_p9 = pnand %p1151_p8, %p1145_p5 }
  0x28   : > { %1155 = shalt.err (!%p1152_p9)
}
  0x29   : > { %s1328_s17 = smov [#allocation3]   ;;  %260 = sbr.rel (%p1436_p10) target bundleno = 565 (0x235), region = 40 }
  0x2a   : > { %987 = dma.vmem_to_smem (!%p985_p0), %s203_s14, 16, %s1328_s17, [#allocation5]  }
  0x30   : > { %1253 = dma.done.wait (%p1444_p13), [#allocation5], 16  }
  0x31   : > { %1255 = vsyncadd (%p1444_p13), [#allocation5], 4294967280 }
  0x32   : > { %266 = sfence }
  0x33   : > { %s1785_s18 = sand.u32 1, %s1266_s21   ;;  %s1464_s19 = sshll.u32 %s1274_s23, 1 }
  0x34   : > { %s958_s1 = sshll.u32 %s1785_s18, 4  ;;  %p315_p9 = scmp.lt.s32.totalorder %s1278_s24, 1 }
  0x35   : > { %p317_p10 = scmp.lt.s32.totalorder %s1464_s19, 3  ;;  %s1798_s2 = sld [smem:[#allocation13_spill]] }
  0x36   : > { %s316_s28 = scalar_select %p315_p9, %s1278_s24, 1 }
  0x37   : > { %s318_s6 = scalar_select %p317_p10, %s1464_s19, 3 }
  0x38   : > { %s977_s9 = smul.u32 12, %s316_s28  ;;  %s1486_s28 = scalar_lea.vmem [#allocation6], %s958_s1 }
  0x39   : > { %s976_s10 = smul.u32 3, %s318_s6  ;;  %p965_p11 = scmp.ne.s32.totalorder %s1274_s23, 0 }
  0x3a   : > { %vm351_vm0 = vcmask (!%p965_p11), 130048   ;;  %v1329_v0 = vmov (!%p965_p11), 0.0  }
  0x3b   : > { %s321_s11 = sadd.s32 %s977_s9, %s976_s10  ;;  %350 = sbr.rel (%p965_p11) target bundleno = 66 (0x42), region = 48  ;;  %352 = vst.msk [vmem:[%s1486_s28] sm:$0xff] (!%p965_p11), %vm351_vm0, %v1329_v0  ;;  %353 = vst.msk [vmem:[%s1486_s28 + $0x8] sm:$0xff] (!%p965_p11), %vm351_vm0, %v1329_v0 }
  0x3c   : > { %s1472_s12 = sshll.u32 %s321_s11, 3 }
  0x3d   : > { %s323_s16 = scalar_lea.vmem %s1798_s2, %s1472_s12 }
  0x42 PF: > { %v1491_v1 = vmov 0.0   ;;  %v1493_v2 = vmov 0.0   ;;  %s1495_s0 = smov 0  }
  0x43 LB: >> { %s363_s29 = sadd.s32 %s1302_s0, %s1464_s19  ;;  %s382_s30 = smul.u32 24, %s1302_s0  ;;  %s1302_s0 = sphi %s1495_s0, %s359_s0   ;;  %v1298_v2 = vphi %v1493_v2, %v1801_v2   ;;  %v1294_v1 = vphi %v1491_v1, %v1800_v1  }
  0x44   : >> { %s1509_s1 = smul.u32 9, %s363_s29  ;;  %s359_s0 = sadd.s32 1, %s1302_s0  }
  0x45   : >> { %s1516_s10 = scalar_lea.vmem %s323_s16, %s382_s30  ;;  %p356_p12 = scmp.ge.s32.totalorder %s359_s0, 2  }
  0x46   : >> { %s368_s11 = sadd.s32 2, %s1509_s1  ;;  %s366_s13 = sadd.s32 1, %s1509_s1  ;;  %v384_v3 = vld [vmem:[%s1516_s10] sm:$0xff]  ;;  %v385_v4 = vld [vmem:[%s1516_s10 + $0x8] sm:$0xff] }
  0x47   : >> { %s369_s14 = sld [smem:[#allocation3 + %s368_s11]]  ;;  %s372_s29 = sadd.s32 4, %s1509_s1  ;;  %v418_v9 = vld [vmem:[%s1516_s10 + $0x9] sm:$0xff]  ;;  %v417_v13 = vld [vmem:[%s1516_s10 + $0x1] sm:$0xff] }
  0x48   : >> { %s367_s17 = sld [smem:[#allocation3 + %s366_s13]]  ;;  %s374_s6 = sadd.s32 5, %s1509_s1  ;;  %v451_v16 = vld [vmem:[%s1516_s10 + $0xa] sm:$0xff]  ;;  %v450_v19 = vld [vmem:[%s1516_s10 + $0x2] sm:$0xff] }
  0x49   : >> { %s373_s9 = sld [smem:[#allocation3 + %s372_s29]]  ;;  %s370_s2 = sadd.s32 3, %s1509_s1 }
  0x4a   : >> { %s1523_s26 = sld [smem:[#allocation3 + %s374_s6]]  ;;  %s376_s11 = sadd.s32 6, %s1509_s1 }
  0x4b   : >> { %s1526_s18 = sld [smem:[#allocation3 + %s1509_s1]]  ;;  %s378_s13 = sadd.s32 7, %s1509_s1 }
  0x4c   : >> { %s1530_s30 = sld [smem:[#allocation3 + %s370_s2]]  ;;  %s1330_s6 = smov 126  }
  0x4d   : >> { %v404_v5 = vstv %s369_s14  ;;  %s377_s29 = sld [smem:[#allocation3 + %s376_s11]]  ;;  %s1331_s14 = smov 127  }
  0x4e   : >> { %v391_v6 = vstv %s367_s17  ;;  %v405_v7 = vmul.f32 %v404_v5, %v384_v3  ;;  %v406_v10 = vmul.f32 %v404_v5, %v385_v4  ;;  %s379_s2 = sld [smem:[#allocation3 + %s378_s13]]  ;;  %s380_s17 = sadd.s32 8, %s1509_s1 }
  0x4f   : >> { %v392_v8 = vmul.f32 %v391_v6, %v384_v3  ;;  %v393_v11 = vmul.f32 %v391_v6, %v385_v4  ;;  %v424_v12 = vstv %s373_s9  ;;  %s381_s9 = sld [smem:[#allocation3 + %s380_s17]] }
  0x50   : >> { %409 = vrot.lane.b32.xlu1 %v405_v7, %s1330_s6  ;;  %v426_v14 = vmul.f32 %v424_v12, %v418_v9  ;;  %v425_v15 = vmul.f32 %v424_v12, %v417_v13  ;;  %v437_v24 = vstv %s1523_s26  ;;  %s1567_s26 = smov (%p356_p12), 0  }
  0x51   : >> { %396 = vrot.lane.b32.xlu0 %v392_v8, %s1331_s14  ;;  %v386_v17 = vstv %s1526_s18  ;;  %v439_v28 = vmul.f32 %v437_v24, %v418_v9  ;;  %v438_v29 = vmul.f32 %v437_v24, %v417_v13 }
  0x52   : >> { %v419_v18 = vstv %s1530_s30  ;;  %v387_v20 = vmul.f32 %v386_v17, %v384_v3  ;;  %v388_v21 = vmul.f32 %v386_v17, %v385_v4 }
  0x53   : >> { %v421_v22 = vmul.f32 %v419_v18, %v418_v9  ;;  %v452_v23 = vstv %s377_s29  ;;  %v420_v25 = vmul.f32 %v419_v18, %v417_v13 }
  0x54   : >> { %411 = vrot.lane.b32.xlu1 %v406_v10, %s1330_s6  ;;  %v454_v26 = vmul.f32 %v452_v23, %v451_v16  ;;  %v453_v27 = vmul.f32 %v452_v23, %v450_v19  ;;  %v457_v30 = vstv %s379_s2  ;;  %v389_v36 = vadd.f32 %v1298_v2, %v387_v20 }
  0x55   : >> { %398 = vrot.lane.b32.xlu0 %v393_v11, %s1331_s14  ;;  %v459_v31 = vmul.f32 %v457_v30, %v451_v16  ;;  %v458_v32 = vmul.f32 %v457_v30, %v450_v19  ;;  %v470_v33 = vstv %s381_s9  ;;  %v390_v40 = vadd.f32 %v1294_v1, %v388_v21 }
  0x56   : >> { %v472_v34 = vmul.f32 %v470_v33, %v451_v16  ;;  %v471_v35 = vmul.f32 %v470_v33, %v450_v19 }
  0x58   : >> { %431 = vrot.lane.b32.xlu1 %v426_v14, %s1331_s14 }
  0x59   : >> { %429 = vrot.lane.b32.xlu0 %v425_v15, %s1331_s14 }
  0x5c   : >> { %444 = vrot.lane.b32.xlu1 %v439_v28, %s1330_s6 }
  0x5d   : >> { %442 = vrot.lane.b32.xlu0 %v438_v29, %s1330_s6 }
  0x60   : >> { %464 = vrot.lane.b32.xlu1 %v459_v31, %s1331_s14 }
  0x61   : >> { %462 = vrot.lane.b32.xlu0 %v458_v32, %s1331_s14 }
  0x64   : >> { %477 = vrot.lane.b32.xlu1 %v472_v34, %s1330_s6 }
  0x65   : >> { %475 = vrot.lane.b32.xlu0 %v471_v35, %s1330_s6 }
  0xc2   : >> { %v410_v37 = vpop.permute.xlu1 %409 }
  0xc3   : >> { %v397_v38 = vpop.permute.xlu0 %396 }
  0xc4   : >> { %v402_v39 = vadd.f32 %v397_v38, %v389_v36 }
  0xc6   : >> { %v415_v41 = vadd.f32 %v410_v37, %v402_v39  ;;  %v412_v42 = vpop.permute.xlu1 %411 }
  0xc7   : >> { %v399_v43 = vpop.permute.xlu0 %398 }
  0xc8   : >> { %v403_v44 = vadd.f32 %v399_v43, %v390_v40  ;;  %v422_v45 = vadd.f32 %v420_v25, %v415_v41 }
  0xca   : >> { %v416_v46 = vadd.f32 %v412_v42, %v403_v44  ;;  %v432_v47 = vpop.permute.xlu1 %431 }
  0xcb   : >> { %v430_v48 = vpop.permute.xlu0 %429 }
  0xcc   : >> { %v423_v49 = vadd.f32 %v421_v22, %v416_v46  ;;  %v435_v51 = vadd.f32 %v430_v48, %v422_v45 }
  0xce   : >> { %v436_v50 = vadd.f32 %v432_v47, %v423_v49  ;;  %v445_v52 = vpop.permute.xlu1 %444 }
  0xcf   : >> { %v443_v53 = vpop.permute.xlu0 %442 }
  0xd0   : >> { %v449_v54 = vadd.f32 %v445_v52, %v436_v50  ;;  %v448_v55 = vadd.f32 %v443_v53, %v435_v51 }
  0xd2   : >> { %v456_v56 = vadd.f32 %v454_v26, %v449_v54  ;;  %v455_v57 = vadd.f32 %v453_v27, %v448_v55  ;;  %v465_v58 = vpop.permute.xlu1 %464 }
  0xd3   : >> { %v463_v59 = vpop.permute.xlu0 %462 }
  0xd4   : >> { %v469_v60 = vadd.f32 %v465_v58, %v456_v56  ;;  %v468_v61 = vadd.f32 %v463_v59, %v455_v57  ;;  %358 = sbr.rel (!%p356_p12) target bundleno = 67 (0x43), region = 118 }
  0xd6   : >> { %v478_v62 = vpop.permute.xlu1 %477 }
  0xd7   : >> { %v476_v63 = vpop.permute.xlu0 %475  ;;  %v482_v0 = vadd.f32 %v478_v62, %v469_v60  }
  0xd8   : >> { %v481_v3 = vadd.f32 %v476_v63, %v468_v61  }
  0xd9   : >> { %v1800_v1 = vmov %v482_v0 }
  0xda   : >> { %v1801_v2 = vmov %v481_v3 }
  0xdb LB: >> { %s492_s18 = sadd.s32 4, %s1464_s19  ;;  %s512_s0 = smul.u32 24, %s1314_s26  ;;  %s1314_s26 = sphi %s1567_s26, %s488_s26   ;;  %v1310_v3 = vphi %v481_v3, %v1804_v3   ;;  %v1306_v0 = vphi %v482_v0, %v1803_v0  }
  0xdc   : >> { %s493_s16 = sadd.s32 %s1314_s26, %s492_s18  ;;  %s1802_s11 = scalar_lea.vmem %s1782_s3, %s1472_s12 }
  0xdd   : >> { %s1581_s1 = smul.u32 9, %s493_s16  ;;  %s1588_s13 = scalar_lea.vmem %s1802_s11, %s512_s0 }
  0xde   : >> { %v514_v1 = vld [vmem:[%s1588_s13] sm:$0xff]  ;;  %v515_v2 = vld [vmem:[%s1588_s13 + $0x8] sm:$0xff]  ;;  %s488_s26 = sadd.s32 1, %s1314_s26  }
  0xdf   : >> { %s498_s29 = sadd.s32 2, %s1581_s1  ;;  %s496_s6 = sadd.s32 1, %s1581_s1  ;;  %v548_v8 = vld [vmem:[%s1588_s13 + $0x9] sm:$0xff]  ;;  %v547_v12 = vld [vmem:[%s1588_s13 + $0x1] sm:$0xff] }
  0xe0   : >> { %s499_s14 = sld [smem:[#allocation3 + %s498_s29]]  ;;  %s502_s17 = sadd.s32 4, %s1581_s1  ;;  %v581_v15 = vld [vmem:[%s1588_s13 + $0xa] sm:$0xff]  ;;  %v580_v18 = vld [vmem:[%s1588_s13 + $0x2] sm:$0xff] }
  0xe1   : >> { %s497_s2 = sld [smem:[#allocation3 + %s496_s6]]  ;;  %s504_s9 = sadd.s32 5, %s1581_s1 }
  0xe2   : >> { %s503_s18 = sld [smem:[#allocation3 + %s502_s17]]  ;;  %s500_s30 = sadd.s32 3, %s1581_s1 }
  0xe3   : >> { %s1595_s16 = sld [smem:[#allocation3 + %s504_s9]]  ;;  %s506_s11 = sadd.s32 6, %s1581_s1 }
  0xe4   : >> { %s1598_s10 = sld [smem:[#allocation3 + %s1581_s1]]  ;;  %s508_s29 = sadd.s32 7, %s1581_s1 }
  0xe5   : >> { %s1602_s0 = sld [smem:[#allocation3 + %s500_s30]]  ;;  %s1332_s17 = smov 126  }
  0xe6   : >> { %v534_v4 = vstv %s499_s14  ;;  %s507_s6 = sld [smem:[#allocation3 + %s506_s11]]  ;;  %s1333_s14 = smov 127  }
  0xe7   : >> { %v521_v5 = vstv %s497_s2  ;;  %v535_v6 = vmul.f32 %v534_v4, %v514_v1  ;;  %v536_v9 = vmul.f32 %v534_v4, %v515_v2  ;;  %s509_s2 = sld [smem:[#allocation3 + %s508_s29]]  ;;  %s510_s9 = sadd.s32 8, %s1581_s1 }
  0xe8   : >> { %v522_v7 = vmul.f32 %v521_v5, %v514_v1  ;;  %v523_v10 = vmul.f32 %v521_v5, %v515_v2  ;;  %v554_v11 = vstv %s503_s18  ;;  %s511_s18 = sld [smem:[#allocation3 + %s510_s9]]  ;;  %p485_p13 = scmp.ge.s32.totalorder %s488_s26, 2  }
  0xe9   : >> { %539 = vrot.lane.b32.xlu1 %v535_v6, %s1332_s17  ;;  %v556_v13 = vmul.f32 %v554_v11, %v548_v8  ;;  %v555_v14 = vmul.f32 %v554_v11, %v547_v12  ;;  %v567_v23 = vstv %s1595_s16  ;;  %s1639_s1 = smov (%p485_p13), 0  }
  0xea   : >> { %526 = vrot.lane.b32.xlu0 %v522_v7, %s1333_s14  ;;  %v516_v16 = vstv %s1598_s10  ;;  %v569_v27 = vmul.f32 %v567_v23, %v548_v8  ;;  %v568_v28 = vmul.f32 %v567_v23, %v547_v12 }
  0xeb   : >> { %v549_v17 = vstv %s1602_s0  ;;  %v517_v19 = vmul.f32 %v516_v16, %v514_v1  ;;  %v518_v20 = vmul.f32 %v516_v16, %v515_v2 }
  0xec   : >> { %v551_v21 = vmul.f32 %v549_v17, %v548_v8  ;;  %v582_v22 = vstv %s507_s6  ;;  %v550_v24 = vmul.f32 %v549_v17, %v547_v12 }
  0xed   : >> { %541 = vrot.lane.b32.xlu1 %v536_v9, %s1332_s17  ;;  %v584_v25 = vmul.f32 %v582_v22, %v581_v15  ;;  %v583_v26 = vmul.f32 %v582_v22, %v580_v18  ;;  %v587_v29 = vstv %s509_s2  ;;  %v519_v35 = vadd.f32 %v1310_v3, %v517_v19 }
  0xee   : >> { %528 = vrot.lane.b32.xlu0 %v523_v10, %s1333_s14  ;;  %v589_v30 = vmul.f32 %v587_v29, %v581_v15  ;;  %v588_v31 = vmul.f32 %v587_v29, %v580_v18  ;;  %v600_v32 = vstv %s511_s18  ;;  %v520_v39 = vadd.f32 %v1306_v0, %v518_v20 }
  0xef   : >> { %v602_v33 = vmul.f32 %v600_v32, %v581_v15  ;;  %v601_v34 = vmul.f32 %v600_v32, %v580_v18 }
  0xf1   : >> { %561 = vrot.lane.b32.xlu1 %v556_v13, %s1333_s14 }
  0xf2   : >> { %559 = vrot.lane.b32.xlu0 %v555_v14, %s1333_s14 }
  0xf5   : >> { %574 = vrot.lane.b32.xlu1 %v569_v27, %s1332_s17 }
  0xf6   : >> { %572 = vrot.lane.b32.xlu0 %v568_v28, %s1332_s17 }
  0xf9   : >> { %594 = vrot.lane.b32.xlu1 %v589_v30, %s1333_s14 }
  0xfa   : >> { %592 = vrot.lane.b32.xlu0 %v588_v31, %s1333_s14 }
  0xfd   : >> { %607 = vrot.lane.b32.xlu1 %v602_v33, %s1332_s17 }
  0xfe   : >> { %605 = vrot.lane.b32.xlu0 %v601_v34, %s1332_s17 }
 0x15b   : >> { %v540_v36 = vpop.permute.xlu1 %539 }
 0x15c   : >> { %v527_v37 = vpop.permute.xlu0 %526 }
 0x15d   : >> { %v532_v38 = vadd.f32 %v527_v37, %v519_v35 }
 0x15f   : >> { %v545_v40 = vadd.f32 %v540_v36, %v532_v38  ;;  %v542_v41 = vpop.permute.xlu1 %541 }
 0x160   : >> { %v529_v42 = vpop.permute.xlu0 %528 }
 0x161   : >> { %v533_v43 = vadd.f32 %v529_v42, %v520_v39  ;;  %v552_v44 = vadd.f32 %v550_v24, %v545_v40 }
 0x163   : >> { %v546_v45 = vadd.f32 %v542_v41, %v533_v43  ;;  %v562_v46 = vpop.permute.xlu1 %561 }
 0x164   : >> { %v560_v47 = vpop.permute.xlu0 %559 }
 0x165   : >> { %v553_v48 = vadd.f32 %v551_v21, %v546_v45  ;;  %v565_v50 = vadd.f32 %v560_v47, %v552_v44 }
 0x167   : >> { %v566_v49 = vadd.f32 %v562_v46, %v553_v48  ;;  %v575_v51 = vpop.permute.xlu1 %574 }
 0x168   : >> { %v573_v52 = vpop.permute.xlu0 %572 }
 0x169   : >> { %v579_v53 = vadd.f32 %v575_v51, %v566_v49  ;;  %v578_v54 = vadd.f32 %v573_v52, %v565_v50 }
 0x16b   : >> { %v586_v55 = vadd.f32 %v584_v25, %v579_v53  ;;  %v585_v56 = vadd.f32 %v583_v26, %v578_v54  ;;  %v595_v57 = vpop.permute.xlu1 %594 }
 0x16c   : >> { %v593_v58 = vpop.permute.xlu0 %592 }
 0x16d   : >> { %v599_v59 = vadd.f32 %v595_v57, %v586_v55  ;;  %v598_v60 = vadd.f32 %v593_v58, %v585_v56  ;;  %487 = sbr.rel (!%p485_p13) target bundleno = 219 (0xdb), region = 129 }
 0x16f   : >> { %v608_v61 = vpop.permute.xlu1 %607 }
 0x170   : >> { %v606_v62 = vpop.permute.xlu0 %605  ;;  %v612_v63 = vadd.f32 %v608_v61, %v599_v59  }
 0x171   : >> { %v611_v1 = vadd.f32 %v606_v62, %v598_v60  }
 0x172   : >> { %v1803_v0 = vmov %v612_v63 }
 0x173   : >> { %v1804_v3 = vmov %v611_v1 }
 0x174 LB: >> { %s622_s26 = sadd.s32 8, %s1464_s19  ;;  %s642_s16 = smul.u32 24, %s1326_s1  ;;  %s1326_s1 = sphi %s1639_s1, %s618_s1   ;;  %v1322_v1 = vphi %v611_v1, %v1807_v1   ;;  %v1318_v63 = vphi %v612_v63, %v1806_v63  }
 0x175   : >> { %s623_s13 = sadd.s32 %s1326_s1, %s622_s26  ;;  %s1805_s11 = scalar_lea.vmem %s1783_s4, %s1472_s12 }
 0x176   : >> { %s1653_s10 = smul.u32 9, %s623_s13  ;;  %s1660_s29 = scalar_lea.vmem %s1805_s11, %s642_s16 }
 0x177   : >> { %v644_v0 = vld [vmem:[%s1660_s29] sm:$0xff]  ;;  %v645_v3 = vld [vmem:[%s1660_s29 + $0x8] sm:$0xff]  ;;  %s618_s1 = sadd.s32 1, %s1326_s1  }
 0x178   : >> { %s628_s6 = sadd.s32 2, %s1653_s10  ;;  %s626_s17 = sadd.s32 1, %s1653_s10  ;;  %v678_v7 = vld [vmem:[%s1660_s29 + $0x9] sm:$0xff]  ;;  %v677_v11 = vld [vmem:[%s1660_s29 + $0x1] sm:$0xff] }
 0x179   : >> { %s629_s14 = sld [smem:[#allocation3 + %s628_s6]]  ;;  %s632_s9 = sadd.s32 4, %s1653_s10  ;;  %v711_v14 = vld [vmem:[%s1660_s29 + $0xa] sm:$0xff]  ;;  %v710_v17 = vld [vmem:[%s1660_s29 + $0x2] sm:$0xff] }
 0x17a   : >> { %s627_s2 = sld [smem:[#allocation3 + %s626_s17]]  ;;  %s634_s18 = sadd.s32 5, %s1653_s10 }
 0x17b   : >> { %s633_s26 = sld [smem:[#allocation3 + %s632_s9]]  ;;  %s630_s0 = sadd.s32 3, %s1653_s10 }
 0x17c   : >> { %s1667_s13 = sld [smem:[#allocation3 + %s634_s18]]  ;;  %s636_s11 = sadd.s32 6, %s1653_s10 }
 0x17d   : >> { %s1670_s30 = sld [smem:[#allocation3 + %s1653_s10]]  ;;  %s638_s6 = sadd.s32 7, %s1653_s10 }
 0x17e   : >> { %s1674_s16 = sld [smem:[#allocation3 + %s630_s0]]  ;;  %s1334_s9 = smov 126  }
 0x17f   : >> { %v664_v2 = vstv %s629_s14  ;;  %s637_s17 = sld [smem:[#allocation3 + %s636_s11]]  ;;  %s1335_s14 = smov 127  }
 0x180   : >> { %v651_v4 = vstv %s627_s2  ;;  %v665_v5 = vmul.f32 %v664_v2, %v644_v0  ;;  %v666_v8 = vmul.f32 %v664_v2, %v645_v3  ;;  %s639_s2 = sld [smem:[#allocation3 + %s638_s6]]  ;;  %s640_s18 = sadd.s32 8, %s1653_s10 }
 0x181   : >> { %v652_v6 = vmul.f32 %v651_v4, %v644_v0  ;;  %v653_v9 = vmul.f32 %v651_v4, %v645_v3  ;;  %v684_v10 = vstv %s633_s26  ;;  %s641_s26 = sld [smem:[#allocation3 + %s640_s18]]  ;;  %p615_p0 = scmp.ge.s32.totalorder %s618_s1, 2  }
 0x182   : >> { %669 = vrot.lane.b32.xlu1 %v665_v5, %s1334_s9  ;;  %v686_v12 = vmul.f32 %v684_v10, %v678_v7  ;;  %v685_v13 = vmul.f32 %v684_v10, %v677_v11  ;;  %v697_v22 = vstv %s1667_s13  ;;  %vm747_vm1 = vcmask (%p615_p0), 130048   ;;  %p969_p1 = scmp.ne.s32.totalorder (%p615_p0), %s1274_s23, 1 }
 0x183   : >> { %656 = vrot.lane.b32.xlu0 %v652_v6, %s1335_s14  ;;  %v646_v15 = vstv %s1670_s30  ;;  %v699_v26 = vmul.f32 %v697_v22, %v678_v7  ;;  %v698_v27 = vmul.f32 %v697_v22, %v677_v11 }
 0x184   : >> { %v679_v16 = vstv %s1674_s16  ;;  %v647_v18 = vmul.f32 %v646_v15, %v644_v0  ;;  %v648_v19 = vmul.f32 %v646_v15, %v645_v3  ;;  %v744_v3 = vld [vmem:[%s1486_s28 + $0x8] sm:$0xff] (%p615_p0) }
 0x185   : >> { %v681_v20 = vmul.f32 %v679_v16, %v678_v7  ;;  %v712_v21 = vstv %s637_s17  ;;  %v680_v23 = vmul.f32 %v679_v16, %v677_v11 }
 0x186   : >> { %671 = vrot.lane.b32.xlu1 %v666_v8, %s1334_s9  ;;  %v714_v24 = vmul.f32 %v712_v21, %v711_v14  ;;  %v713_v25 = vmul.f32 %v712_v21, %v710_v17  ;;  %v717_v28 = vstv %s639_s2  ;;  %v649_v34 = vadd.f32 %v1322_v1, %v647_v18 }
 0x187   : >> { %658 = vrot.lane.b32.xlu0 %v653_v9, %s1335_s14  ;;  %v719_v29 = vmul.f32 %v717_v28, %v711_v14  ;;  %v718_v30 = vmul.f32 %v717_v28, %v710_v17  ;;  %v730_v31 = vstv %s641_s26  ;;  %v650_v38 = vadd.f32 %v1318_v63, %v648_v19 }
 0x188   : >> { %v732_v32 = vmul.f32 %v730_v31, %v711_v14  ;;  %v731_v33 = vmul.f32 %v730_v31, %v710_v17 }
 0x18a   : >> { %691 = vrot.lane.b32.xlu1 %v686_v12, %s1335_s14 }
 0x18b   : >> { %689 = vrot.lane.b32.xlu0 %v685_v13, %s1335_s14 }
 0x18e   : >> { %704 = vrot.lane.b32.xlu1 %v699_v26, %s1334_s9 }
 0x18f   : >> { %702 = vrot.lane.b32.xlu0 %v698_v27, %s1334_s9 }
 0x192   : >> { %724 = vrot.lane.b32.xlu1 %v719_v29, %s1335_s14 }
 0x193   : >> { %722 = vrot.lane.b32.xlu0 %v718_v30, %s1335_s14 }
 0x196   : >> { %737 = vrot.lane.b32.xlu1 %v732_v32, %s1334_s9 }
 0x197   : >> { %735 = vrot.lane.b32.xlu0 %v731_v33, %s1334_s9 }
 0x1f4   : >> { %v670_v35 = vpop.permute.xlu1 %669 }
 0x1f5   : >> { %v657_v36 = vpop.permute.xlu0 %656 }
 0x1f6   : >> { %v662_v37 = vadd.f32 %v657_v36, %v649_v34 }
 0x1f8   : >> { %v675_v39 = vadd.f32 %v670_v35, %v662_v37  ;;  %v672_v40 = vpop.permute.xlu1 %671 }
 0x1f9   : >> { %v659_v41 = vpop.permute.xlu0 %658 }
 0x1fa   : >> { %v663_v42 = vadd.f32 %v659_v41, %v650_v38  ;;  %v682_v43 = vadd.f32 %v680_v23, %v675_v39 }
 0x1fc   : >> { %v676_v44 = vadd.f32 %v672_v40, %v663_v42  ;;  %v692_v45 = vpop.permute.xlu1 %691 }
 0x1fd   : >> { %v690_v46 = vpop.permute.xlu0 %689 }
 0x1fe   : >> { %v683_v47 = vadd.f32 %v681_v20, %v676_v44  ;;  %v695_v49 = vadd.f32 %v690_v46, %v682_v43 }
 0x200   : >> { %v696_v48 = vadd.f32 %v692_v45, %v683_v47  ;;  %v705_v50 = vpop.permute.xlu1 %704 }
 0x201   : >> { %v703_v51 = vpop.permute.xlu0 %702 }
 0x202   : >> { %v709_v52 = vadd.f32 %v705_v50, %v696_v48  ;;  %v708_v53 = vadd.f32 %v703_v51, %v695_v49 }
 0x204   : >> { %v716_v54 = vadd.f32 %v714_v24, %v709_v52  ;;  %v715_v55 = vadd.f32 %v713_v25, %v708_v53  ;;  %v725_v56 = vpop.permute.xlu1 %724 }
 0x205   : >> { %v723_v57 = vpop.permute.xlu0 %722 }
 0x206   : >> { %v729_v58 = vadd.f32 %v725_v56, %v716_v54  ;;  %v728_v59 = vadd.f32 %v723_v57, %v715_v55  ;;  %617 = sbr.rel (!%p615_p0) target bundleno = 372 (0x174), region = 140 }
 0x208   : >> { %v738_v60 = vpop.permute.xlu1 %737 }
 0x209   : >> { %v736_v61 = vpop.permute.xlu0 %735  ;;  %v742_v62 = vadd.f32 %v738_v60, %v729_v58  }
 0x20a   : >> { %v741_v0 = vadd.f32 %v736_v61, %v728_v59  }
 0x20b   : >> { %v1806_v63 = vmov %v742_v62  ;;  %v746_v4 = vadd.f32 (%p615_p0), %v744_v3, %v742_v62 }
 0x20c   : >> { %v1807_v1 = vmov %v741_v0 }
 0x20d   : > { %v743_v1 = vld [vmem:[%s1486_s28] sm:$0xff]  ;;  %749 = vst.msk [vmem:[%s1486_s28 + $0x8] sm:$0xff] %vm747_vm1, %v746_v4  ;;  %753 = sbr.rel (%p969_p1) target bundleno = 539 (0x21b), region = 73  ;;  %s756_s10 = sld [smem:[#allocation2]] (!%p969_p1) }
 0x20e   : > { %v745_v2 = vadd.f32 %v743_v1, %v741_v0 }
 0x210   : > { %748 = vst.msk [vmem:[%s1486_s28] sm:$0xff] %vm747_vm1, %v745_v2 }
 0x213   : > { %v757_v6 = vstv (!%p969_p1), %s756_s10 }
 0x214   : > { %v755_v63 = vld [vmem:[%s1486_s28 + $0x8] sm:$0xff] }
 0x215   : > { %v759_v8 = vadd.f32 %v757_v6, %v755_v63 }
 0x217   : > { %v754_v5 = vld [vmem:[%s1486_s28] sm:$0xff]  ;;  %761 = vst.msk [vmem:[%s1486_s28 + $0x8] sm:$0xff] %vm747_vm1, %v759_v8 }
 0x218   : > { %v758_v7 = vadd.f32 %v757_v6, %v754_v5 }
 0x21a   : > { %760 = vst.msk [vmem:[%s1486_s28] sm:$0xff] %vm747_vm1, %v758_v7 }
 0x21b PF: > { %s975_s19 = sshll.u32 %s1278_s24, 8  ;;  %s776_s29 = sshll.u32 %s1486_s28, 4  ;;  %s1723_s29 = int_to_ptr.vmem [resolvable:$true] %s776_s29 }
 0x21c   : > { %s1720_s1 = scalar_lea.hbm %s1784_s5, %s975_s19  ;;  %s1808_s13 = sand.u32 1, %s1266_s21  }
 0x21d   : > { %s1727_s30 = scalar_lea.sflag [#allocation4], %s1808_s13  ;;  %s1156_s0 = scalar_lea.vmem %s1723_s29, 256 }
 0x21e   : > { %p1157_p2 = scmp.ne.s32.totalorder %s1723_s29, %s1156_s0  ;;  %s1336_s24 = smov [#allocation6]  }
 0x21f   : > { %s1160_s16 = sshll.u32 %s1336_s24, 4  ;;  %s1161_s16 = int_to_ptr.vmem [resolvable:$false] %s1160_s16 }
 0x220   : > { %p1158_p4 = pnand %p1157_p2, %p1422_p3  ;;  %s1162_s11 = scalar_lea.vmem %s1161_s16, 512 }
 0x221   : > { %p1163_p6 = scmp.lt.s32.totalorder %s1723_s29, %s1161_s16  ;;  %p1164_p7 = scmp.lt.s32.totalorder %s1162_s11, %s1156_s0 }
 0x222   : > { %p1159_p5 = pneg %p1158_p4 }
 0x223   : > { %p1165_p8 = por %p1164_p7, %p1163_p6 }
 0x225   : > { %p1166_p9 = pnand %p1165_p8, %p1159_p5 }
 0x227   : > { %1169 = shalt.err (!%p1166_p9)
}
 0x228   : > { %s1170_s28 = scalar_lea.hbm %s1720_s1, 256  ;;  %s1174_s9 = scalar_lea.hbm %s1784_s5, 512 }
 0x229   : > { %p1171_p10 = scmp.ne.s32.totalorder %s1720_s1, %s1170_s28  ;;  %p1175_p13 = scmp.lt.u32.totalorder %s1720_s1, %s1784_s5 }
 0x22a   : > { %p1176_p0 = scmp.lt.u32.totalorder %s1174_s9, %s1170_s28  ;;  %p1178_p2 = scmp.lt.u32.totalorder %s1170_s28, %s1720_s1 }
 0x22b   : > { %p1172_p11 = pnand %p1171_p10, %p1422_p3 }
 0x22c   : > { %p1177_p1 = por %p1176_p0, %p1175_p13 }
 0x22d   : > { %p1173_p12 = pneg %p1172_p11 }
 0x22e   : > { %p1179_p4 = por %p1178_p2, %p1177_p1 }
 0x230   : > { %p1180_p5 = pnand %p1179_p4, %p1173_p12 }
 0x232   : > { %1183 = shalt.err (!%p1180_p5)
}
 0x233   : > { %s1337_s18 = smov 128   ;;  %s1338_s26 = smov 8  }
 0x234   : > { %982 = dma.vmem_to_hbm [thread:$0]  (%p1422_p3), %s1723_s29, 256, %s1720_s1, %s1727_s30, %s1337_s18, %s1337_s18, %s1338_s26  }
 0x235 PF: > { %p994_p6 = scmp.ge.s32.totalorder %s1290_s27, 2  ;;  %s791_s10 = sand.u32 1, %s1262_s20  }
 0x236   : > { %p1809_p7 = scmp.ne.s32.totalorder %s1794_s8, 0  ;;  %s792_s19 = scalar_lea.sflag [#allocation4], %s791_s10 }
 0x238   : > { %p989_p8 = pnand %p994_p6, %p1809_p7 }
 0x23a   : > { %1257 = dma.done.wait (!%p989_p8), %s792_s19, 256  }
 0x23b   : > { %1259 = vsyncadd (!%p989_p8), %s792_s19, 4294967040  ;;  %s20_s27 = sadd.s32 1, %s1290_s27   ;;  %s1810_s24 = sld [smem:[#allocation9_spill]] }
 0x23c   : > { %p17_p9 = scmp.ge.s32.totalorder %s20_s27, 6   ;;  %s1811_s7 = sld [smem:[#allocation10_spill]] }
 0x23d   : > { %s1812_s26 = sld [smem:[#allocation11_spill]]  ;;  %s1813_s20 = smov %s1266_s21 }
 0x23e   : > { %s1814_s21 = smov %s1270_s22  ;;  %s1815_s22 = smov %s1452_s15 }
 0x23f   : > { %s1816_s23 = smov %s1282_s25  ;;  %19 = sbr.rel (!%p17_p9) target bundleno = 10 (0xa), region = 151 }
 0x242   : > { %s1817_s25 = smov %s1811_s7 }
 0x246   :  { %797 = vsyncpa [#allocation4], 1 }
 0x247   :  { %799 = vsyncpa [#allocation4 + $0x1], 1 }
 0x248   :  { %800 = vsyncpa [#allocation5], 1 }
 0x249   :  { %802 = vsyncpa [#allocation5 + $0x1], 1 }

</bundles_post_ra>
